<compile_context>
chip_gen: v6e
topology: v6e:2x2x1
jax: 0.10.0
libtpu: 0.0.40
codegen_flags: <defaults>
</compile_context>

<pallas_src>
import jax
import jax.numpy as jnp
from jax.experimental import pallas as pl
from jax.experimental.pallas import tpu as pltpu


# ----------------------------- parameter glue ------------------------------

def ortho2rotation(poses):
    """poses: (B, 6) -> (B, 3, 3) rotation matrices (columns x, y, z)."""
    x_raw = poses[:, 0:3]
    y_raw = poses[:, 3:6]

    def normalize(v):
        mag = jnp.sqrt(jnp.sum(v ** 2, axis=1, keepdims=True))
        mag = jnp.maximum(mag, 1e-8)
        return v / mag

    def proj_u2a(u, a):
        inner = jnp.sum(u * a, axis=1, keepdims=True)
        norm2 = jnp.maximum(jnp.sum(u ** 2, axis=1, keepdims=True), 1e-8)
        return (inner / norm2) * u

    x = normalize(x_raw)
    y = normalize(y_raw - proj_u2a(x, y_raw))
    z = jnp.cross(x, y)
    # torch.cat((x[:,:,None], y[:,:,None], z[:,:,None]), 2)
    return jnp.stack([x, y, z], axis=2)


# ------------------------------ Pallas kernel -------------------------------

def _transform_kernel(r_ref, t_ref, pts_ref, out_ref):
    # r_ref: (9,) f32 in SMEM (row-major R).  t_ref: (3,) f32 in SMEM.
    # pts_ref / out_ref: (3, rows_tile, 128) f32 in VMEM — each coordinate plane
    # is a dense (rows_tile, 128) slab (full sublanes + lanes).
    #
    # Load the 12 scalars from SMEM once; broadcasts are reused across the FMAs.
    r00 = r_ref[0]; r01 = r_ref[1]; r02 = r_ref[2]
    r10 = r_ref[3]; r11 = r_ref[4]; r12 = r_ref[5]
    r20 = r_ref[6]; r21 = r_ref[7]; r22 = r_ref[8]
    t0 = t_ref[0]; t1 = t_ref[1]; t2 = t_ref[2]

    x = pts_ref[0]            # (rows_tile, 128) dense tiles
    y = pts_ref[1]
    z = pts_ref[2]

    # out = R @ p + t   — 9 VPU scalar-broadcast FMAs, three full-vreg row stores.
    out_ref[0] = r00 * x + r01 * y + r02 * z + t0
    out_ref[1] = r10 * x + r11 * y + r12 * z + t1
    out_ref[2] = r20 * x + r21 * y + r22 * z + t2


def _round_up(x, m):
    return -(-x // m) * m


def _transform_pallas_soa(pts_t, rot_mat, trans, *, max_rows_tile=2048,
                          target_steps=4):
    """pts_t: SoA (3, N) f32, rot_mat: (3, 3), trans: (1, 3) -> SoA (3, N) f32."""
    n = pts_t.shape[1]

    # Pad only to a multiple of 128 (<= 127 dummy columns) so the free reshape to
    # the sublane-dense (3, rows, 128) view is possible.  No pad-to-tile.
    n_pad128 = _round_up(n, 128)
    if n_pad128 != n:
        pts_t = jnp.pad(pts_t, ((0, 0), (0, n_pad128 - n)))
    rows = n_pad128 // 128
    pts3 = pts_t.reshape(3, rows, 128)            # contiguous -> free reshape

    # Tile: aim for >= target_steps grid steps (2 TCs on v7x + pipelining), cap at
    # max_rows_tile rows (2048 rows = 262,144 points = 3 MiB/buffer; ~12 MiB total
    # double-buffered, inside every chip's scoped-VMEM default).
    rows_tile = max(8, min(max_rows_tile, _round_up(-(-rows // target_steps), 8)))
    grid = (pl.cdiv(rows, rows_tile),)            # ragged last block is masked

    r_flat = rot_mat.reshape(9).astype(jnp.float32)   # row-major R -> SMEM
    t_flat = trans.reshape(3).astype(jnp.float32)     # -> SMEM

    out3 = pl.pallas_call(
        _transform_kernel,
        out_shape=jax.ShapeDtypeStruct((3, rows, 128), jnp.float32),
        grid_spec=pltpu.PrefetchScalarGridSpec(
            num_scalar_prefetch=0,
            grid=grid,
            in_specs=[
                pl.BlockSpec(memory_space=pltpu.MemorySpace.SMEM),       # R (9,)
                pl.BlockSpec(memory_space=pltpu.MemorySpace.SMEM),       # t (3,)
                pl.BlockSpec((3, rows_tile, 128), lambda i: (0, i, 0)),  # points
            ],
            out_specs=pl.BlockSpec((3, rows_tile, 128), lambda i: (0, i, 0)),
        ),
        compiler_params=pltpu.CompilerParams(
            dimension_semantics=("parallel",),    # shards over 2 TCs on v7x
        ),
    )(r_flat, t_flat, pts3)

    return out3.reshape(3, n_pad128)[:, :n]


def transformation_forward_soa(points_soa, rot6d, trans, *,
                               min_kernel_points=4096):
    """SoA entry point: points_soa (3, N) -> (3, N), no wrapper transposes.

    Preferred when the calling module keeps the cloud in SoA layout: the Pallas
    path then moves exactly the 24N-byte roofline traffic.
    """
    rot_mat = ortho2rotation(rot6d)[0]            # (3, 3)
    n = points_soa.shape[1]
    if n < min_kernel_points:
        return (rot_mat @ points_soa.astype(jnp.float32)
                + trans.reshape(3, 1)).astype(points_soa.dtype)
    out = _transform_pallas_soa(points_soa.astype(jnp.float32), rot_mat, trans)
    return out.astype(points_soa.dtype)


def transformation_forward(points, rot6d, trans, *, min_kernel_points=65536):
    """Equivalent of Transformation.forward: points @ R^T + t.

    points: (N, 3) float32 (AoS, module API); rot6d: (1, 6); trans: (1, 3) -> (N, 3).

    The AoS API forces a transpose in and out around the SoA kernel, which alone
    costs ~2x the op's roofline traffic, so the crossover vs. the one-pass fused
    XLA fallback is high — hence the raised default min_kernel_points.
    """
    rot_mat = ortho2rotation(rot6d)[0]            # (3, 3)
    n = points.shape[0]
    if n < min_kernel_points:
        return points @ rot_mat.T + trans
    pts_t = points.T.astype(jnp.float32)          # AoS -> SoA (layout plumbing)
    out_t = _transform_pallas_soa(pts_t, rot_mat, trans)
    return out_t.T.astype(points.dtype)


# ---------------------------------- main ------------------------------------

if __name__ == "__main__":
    key = jax.random.PRNGKey(0)
    k_rot, k_pts_big, k_pts_mid, k_pts_small = jax.random.split(key, 4)

    # Deterministic parameter init (rot6d like torch.rand(1,6); nonzero t_init
    # to exercise the translation broadcast path).
    rot6d = jax.random.uniform(k_rot, (1, 6), dtype=jnp.float32)
    trans = jnp.array([[0.1, -0.2, 0.3]], dtype=jnp.float32)
    rot_mat = ortho2rotation(rot6d)[0]

    # 1) SoA path, ragged N (not a multiple of 128): multi-step grid + masked tail.
    n_big = 20000
    points_big = jax.random.normal(k_pts_big, (n_big, 3), dtype=jnp.float32)
    soa_big = points_big.T                                   # (3, N)
    out_soa = jax.block_until_ready(
        transformation_forward_soa(soa_big, rot6d, trans))
    ref_big = points_big @ rot_mat.T + trans
    assert out_soa.shape == (3, n_big)
    assert jnp.allclose(out_soa.T, ref_big, atol=1e-5, rtol=1e-5)

    # 2) SoA path, N an exact multiple of 128 (no pad, evenly divided grid).
    n_mid = 12800
    points_mid = jax.random.normal(k_pts_mid, (n_mid, 3), dtype=jnp.float32)
    out_mid = jax.block_until_ready(
        transformation_forward_soa(points_mid.T, rot6d, trans))
    ref_mid = points_mid @ rot_mat.T + trans
    assert jnp.allclose(out_mid.T, ref_mid, atol=1e-5, rtol=1e-5)

    # 3) AoS module-equivalent API, forced through the Pallas path
    #    (exercises transpose-in / transpose-out correctness).
    out_aos = jax.block_until_ready(
        transformation_forward(points_big, rot6d, trans, min_kernel_points=1024))
    assert out_aos.shape == (n_big, 3)
    assert jnp.allclose(out_aos, ref_big, atol=1e-5, rtol=1e-5)

    # 4) Tiny cloud exercises the small-N fused-XLA fallback.
    points_small = jax.random.normal(k_pts_small, (256, 3), dtype=jnp.float32)
    out_small = jax.block_until_ready(
        transformation_forward(points_small, rot6d, trans))
    ref_small = points_small @ rot_mat.T + trans
    assert out_small.shape == (256, 3)
    assert jnp.allclose(out_small, ref_small, atol=1e-5, rtol=1e-5)

    print("KERNEL_OK")
</pallas_src>

<mosaic_0001>
module attributes {stable_mosaic.version = 11 : i64} {
  func.func @_transform_kernel(%arg0: i32, %arg1: memref<9xf32, #tpu.memory_space<smem>>, %arg2: memref<3xf32, #tpu.memory_space<smem>>, %arg3: memref<3x40x128xf32, #tpu.memory_space<vmem>>, %arg4: memref<3x40x128xf32, #tpu.memory_space<vmem>>) attributes {dimension_semantics = [#tpu.dimension_semantics<parallel>], iteration_bounds = array<i64: 4>, scalar_prefetch = 0 : i64, scratch_operands = 0 : i64, tpu.core_type = #tpu.core_type<tc>, window_params = [{transform_indices = @transform_0, window_bounds = array<i64: 9>}, {transform_indices = @transform_1, window_bounds = array<i64: 3>}, {transform_indices = @transform_2, window_bounds = array<i64: 3, 40, 128>}, {transform_indices = @transform_3, window_bounds = array<i64: 3, 40, 128>}]} {
    %c0 = arith.constant 0 : index
    %0 = memref.load %arg1[%c0] : memref<9xf32, #tpu.memory_space<smem>>
    %c1 = arith.constant 1 : index
    %1 = memref.load %arg1[%c1] : memref<9xf32, #tpu.memory_space<smem>>
    %c2 = arith.constant 2 : index
    %2 = memref.load %arg1[%c2] : memref<9xf32, #tpu.memory_space<smem>>
    %c3 = arith.constant 3 : index
    %3 = memref.load %arg1[%c3] : memref<9xf32, #tpu.memory_space<smem>>
    %c4 = arith.constant 4 : index
    %4 = memref.load %arg1[%c4] : memref<9xf32, #tpu.memory_space<smem>>
    %c5 = arith.constant 5 : index
    %5 = memref.load %arg1[%c5] : memref<9xf32, #tpu.memory_space<smem>>
    %c6 = arith.constant 6 : index
    %6 = memref.load %arg1[%c6] : memref<9xf32, #tpu.memory_space<smem>>
    %c7 = arith.constant 7 : index
    %7 = memref.load %arg1[%c7] : memref<9xf32, #tpu.memory_space<smem>>
    %c8 = arith.constant 8 : index
    %8 = memref.load %arg1[%c8] : memref<9xf32, #tpu.memory_space<smem>>
    %c0_0 = arith.constant 0 : index
    %9 = memref.load %arg2[%c0_0] : memref<3xf32, #tpu.memory_space<smem>>
    %c1_1 = arith.constant 1 : index
    %10 = memref.load %arg2[%c1_1] : memref<3xf32, #tpu.memory_space<smem>>
    %c2_2 = arith.constant 2 : index
    %11 = memref.load %arg2[%c2_2] : memref<3xf32, #tpu.memory_space<smem>>
    %c0_3 = arith.constant 0 : index
    %c0_4 = arith.constant 0 : index
    %c0_5 = arith.constant 0 : index
    %12 = vector.load %arg3[%c0_3, %c0_4, %c0_5] : memref<3x40x128xf32, #tpu.memory_space<vmem>>, vector<1x40x128xf32>
    %13 = vector.shape_cast %12 : vector<1x40x128xf32> to vector<40x128xf32>
    %c1_6 = arith.constant 1 : index
    %c0_7 = arith.constant 0 : index
    %c0_8 = arith.constant 0 : index
    %14 = vector.load %arg3[%c1_6, %c0_7, %c0_8] : memref<3x40x128xf32, #tpu.memory_space<vmem>>, vector<1x40x128xf32>
    %15 = vector.shape_cast %14 : vector<1x40x128xf32> to vector<40x128xf32>
    %c2_9 = arith.constant 2 : index
    %c0_10 = arith.constant 0 : index
    %c0_11 = arith.constant 0 : index
    %16 = vector.load %arg3[%c2_9, %c0_10, %c0_11] : memref<3x40x128xf32, #tpu.memory_space<vmem>>, vector<1x40x128xf32>
    %17 = vector.shape_cast %16 : vector<1x40x128xf32> to vector<40x128xf32>
    %18 = vector.broadcast %0 : f32 to vector<40x128xf32>
    %19 = arith.mulf %18, %13 : vector<40x128xf32>
    %20 = vector.broadcast %1 : f32 to vector<40x128xf32>
    %21 = arith.mulf %20, %15 : vector<40x128xf32>
    %22 = arith.addf %19, %21 : vector<40x128xf32>
    %23 = vector.broadcast %2 : f32 to vector<40x128xf32>
    %24 = arith.mulf %23, %17 : vector<40x128xf32>
    %25 = arith.addf %22, %24 : vector<40x128xf32>
    %26 = vector.broadcast %9 : f32 to vector<40x128xf32>
    %27 = arith.addf %25, %26 : vector<40x128xf32>
    %c0_12 = arith.constant 0 : index
    %c0_13 = arith.constant 0 : index
    %c0_14 = arith.constant 0 : index
    %28 = vector.load %arg4[%c0_12, %c0_13, %c0_14] : memref<3x40x128xf32, #tpu.memory_space<vmem>>, vector<1x40x128xf32>
    %29 = vector.shape_cast %28 : vector<1x40x128xf32> to vector<40x128xf32>
    %30 = vector.shape_cast %27 : vector<40x128xf32> to vector<1x40x128xf32>
    tpu.vector_store %arg4[%c0_12, %c0_13, %c0_14], %30 {strides = array<i32>} : memref<3x40x128xf32, #tpu.memory_space<vmem>>, vector<1x40x128xf32>,
    %31 = vector.broadcast %3 : f32 to vector<40x128xf32>
    %32 = arith.mulf %31, %13 : vector<40x128xf32>
    %33 = vector.broadcast %4 : f32 to vector<40x128xf32>
    %34 = arith.mulf %33, %15 : vector<40x128xf32>
    %35 = arith.addf %32, %34 : vector<40x128xf32>
    %36 = vector.broadcast %5 : f32 to vector<40x128xf32>
    %37 = arith.mulf %36, %17 : vector<40x128xf32>
    %38 = arith.addf %35, %37 : vector<40x128xf32>
    %39 = vector.broadcast %10 : f32 to vector<40x128xf32>
    %40 = arith.addf %38, %39 : vector<40x128xf32>
    %c1_15 = arith.constant 1 : index
    %c0_16 = arith.constant 0 : index
    %c0_17 = arith.constant 0 : index
    %41 = vector.load %arg4[%c1_15, %c0_16, %c0_17] : memref<3x40x128xf32, #tpu.memory_space<vmem>>, vector<1x40x128xf32>
    %42 = vector.shape_cast %41 : vector<1x40x128xf32> to vector<40x128xf32>
    %43 = vector.shape_cast %40 : vector<40x128xf32> to vector<1x40x128xf32>
    tpu.vector_store %arg4[%c1_15, %c0_16, %c0_17], %43 {strides = array<i32>} : memref<3x40x128xf32, #tpu.memory_space<vmem>>, vector<1x40x128xf32>,
    %44 = vector.broadcast %6 : f32 to vector<40x128xf32>
    %45 = arith.mulf %44, %13 : vector<40x128xf32>
    %46 = vector.broadcast %7 : f32 to vector<40x128xf32>
    %47 = arith.mulf %46, %15 : vector<40x128xf32>
    %48 = arith.addf %45, %47 : vector<40x128xf32>
    %49 = vector.broadcast %8 : f32 to vector<40x128xf32>
    %50 = arith.mulf %49, %17 : vector<40x128xf32>
    %51 = arith.addf %48, %50 : vector<40x128xf32>
    %52 = vector.broadcast %11 : f32 to vector<40x128xf32>
    %53 = arith.addf %51, %52 : vector<40x128xf32>
    %c2_18 = arith.constant 2 : index
    %c0_19 = arith.constant 0 : index
    %c0_20 = arith.constant 0 : index
    %54 = vector.load %arg4[%c2_18, %c0_19, %c0_20] : memref<3x40x128xf32, #tpu.memory_space<vmem>>, vector<1x40x128xf32>
    %55 = vector.shape_cast %54 : vector<1x40x128xf32> to vector<40x128xf32>
    %56 = vector.shape_cast %53 : vector<40x128xf32> to vector<1x40x128xf32>
    tpu.vector_store %arg4[%c2_18, %c0_19, %c0_20], %56 {strides = array<i32>} : memref<3x40x128xf32, #tpu.memory_space<vmem>>, vector<1x40x128xf32>,
    return
  }
  func.func @transform_0(%arg0: i32) -> i32 {
    %c0_i32 = arith.constant 0 : i32
    %c0_i32_0 = arith.constant 0 : i32
    return %c0_i32 : i32
  }
  func.func @transform_1(%arg0: i32) -> i32 {
    %c0_i32 = arith.constant 0 : i32
    %c0_i32_0 = arith.constant 0 : i32
    return %c0_i32 : i32
  }
  func.func @transform_2(%arg0: i32) -> (i32, i32, i32) {
    %c0_i32 = arith.constant 0 : i32
    %c0_i32_0 = arith.constant 0 : i32
    %c0_i32_1 = arith.constant 0 : i32
    return %c0_i32, %arg0, %c0_i32_0 : i32, i32, i32
  }
  func.func @transform_3(%arg0: i32) -> (i32, i32, i32) {
    %c0_i32 = arith.constant 0 : i32
    %c0_i32_0 = arith.constant 0 : i32
    %c0_i32_1 = arith.constant 0 : i32
    return %c0_i32, %arg0, %c0_i32_0 : i32, i32, i32
  }
}

</mosaic_0001>

<bundles_post_ra>
// kernel: tpu_custom_call.1
= control target key start
LH: loop header
LB: loop body
LE: loop exit
PB: predicated region body
PF: predicated region fallthrough
CT: control target
= control target key end

     0   :  { %8 = vsyncpa [#allocation5], 0  ;;  %s1067_s0 = inlined_call_operand.hbm [shape: f32[9], index: 0, kind: input, shape index: {}]   ;;  %s1068_s1 = inlined_call_operand.vmem [shape: f32[3], index: 1, kind: input, shape index: {}]   ;;  %s1069_s2 = inlined_call_operand.hbm [shape: f32[3,157,128], index: 2, kind: input, shape index: {}]   ;;  %s1070_s3 = inlined_call_operand.hbm [shape: f32[3,157,128], index: 3, kind: output, shape index: {}]  }
   0x1   :  { %9 = vsyncpa [#allocation6], 0 }
   0x2   :  { %10 = vsyncpa [#allocation3], 0 }
   0x3   :  { %12 = vsyncpa [#allocation3 + $0x1], 0 }
   0x4   :  { %13 = vsyncpa [#allocation4], 0 }
   0x5   :  { %15 = vsyncpa [#allocation4 + $0x1], 0  ;;  %s768_s12 = smov 0   ;;  %s770_s13 = smov 0  }
   0x6   :  { %s772_s14 = smov 0   ;;  %s774_s15 = smov 0  }
   0x7 LB: > { %s789_s16 = sadd.s32 4294967295, %s731_s15   ;;  %s523_s17 = sadd.s32 4294967294, %s731_s15   ;;  %s731_s15 = sphi %s774_s15, %s1086_s15   ;;  %s727_s14 = sphi %s772_s14, %s1085_s14   ;;  %s723_s13 = sphi %s770_s13, %s1084_s13   ;;  %s719_s12 = sphi %s768_s12, %s1083_s12  }
   0x8   : > { %s793_s18 = sadd.s32 1, %s731_s15   ;;  %s70_s19 = sadd.s32 1, %s727_s14 }
   0x9   : > { %s67_s20 = ssub.s32 %s731_s15, %s793_s18  ;;  %p77_p0 = scmp.ne.s32.totalorder %s727_s14, %s723_s13 }
   0xa   : > { %p68_p1 = scmp.eq.s32.totalorder %s67_s20, 0  ;;  %p78_p2 = scmp.eq.s32.totalorder %s731_s15, 0 }
   0xb   : > { %p83_p3 = scmp.ne.s32.totalorder %s723_s13, %s719_s12  ;;  %p1071_p4 = scmp.eq.s32.totalorder %s789_s16, 0 }
   0xc   : > { %s805_s21 = scalar_select %p68_p1, %s727_s14, %s70_s19  }
   0xd   : > { %p807_p5 = por %p78_p2, %p77_p0  ;;  %p813_p6 = por %p1071_p4, %p83_p3 }
   0xe   : > { %p107_p7 = scmp.eq.s32.totalorder %s789_s16, 3  ;;  %p113_p8 = scmp.eq.s32.totalorder %s523_s17, 3 }
   0xf   : > { %p524_p9 = scmp.ge.s32.totalorder %s731_s15, 1  ;;  %p120_p10 = scmp.lt.s32.totalorder %s731_s15, 5 }
  0x10   : > { %p820_p11 = por %p107_p7, %p77_p0  ;;  %p824_p12 = por %p113_p8, %p83_p3 }
  0x11   : > { %p828_p13 = pnand %p524_p9, %p120_p10  ;;  %s142_s29 = sshll.u32 %s1068_s1, 4  ;;  %s143_s29 = int_to_ptr.vmem [resolvable:$true] %s142_s29 }
  0x12   : > { %s1075_s25 = scalar_select %p824_p12, 1, 0 }
  0x13   : > { %p596_p1 = pneg %p828_p13  ;;  %s733_s4 = smov [#allocation2]  }
  0x14   : > { %s670_s7 = scalar_lea.vmem %s143_s29, 16  ;;  %p678_p9 = scmp.lt.s32.totalorder %s143_s29, %s143_s29 }
  0x15   : > { %p839_p0 = pnand %p596_p1, %p1071_p4  ;;  %p671_p2 = scmp.ne.s32.totalorder %s143_s29, %s670_s7 }
  0x16   : > { %p679_p10 = scmp.lt.s32.totalorder %s670_s7, %s670_s7 }
  0x17   : > { %599 = dma.hbm_to_smem (!%p839_p0), %s1067_s0, 16, %s733_s4, [#allocation5]  }
  0x18   : > { %p672_p3 = pneg %p839_p0  ;;  %p680_p1 = por %p679_p10, %p678_p9 }
  0x1a   : > { %p673_p7 = pnand %p672_p3, %p671_p2 }
  0x1c   : > { %p674_p8 = pneg %p673_p7 }
  0x1e   : > { %p681_p4 = pnand %p680_p1, %p674_p8 }
  0x20   : > { %684 = shalt.err (!%p681_p4)
}
  0x21   : > { %s734_s8 = smov [#allocation7]   ;;  %p527_p12 = scmp.ge.s32.totalorder %s731_s15, 4 }
  0x22   : > { %602 = dma.vmem_to_smem (!%p839_p0), %s143_s29, 16, %s734_s8, [#allocation6]  }
  0x23   : > { %149 = sbr.rel (%p527_p12) target bundleno = 54 (0x36), region = 24 }
  0x28   : > { %s153_s9 = sand.u32 1, %s727_s14   ;;  %s567_s10 = smul.u32 640, %s731_s15 }
  0x29   : > { %s569_s11 = smul.u32 120, %s153_s9  ;;  %s735_s17 = smov 2560  }
  0x2a   : > { %576 = sst [smem:[#allocation11]] (%p807_p5), %s735_s17  ;;  %s163_s28 = scalar_lea.hbm %s1069_s2, %s567_s10 }
  0x2b   : > { %s575_s19 = scalar_select %p807_p5, [#allocation0], [#allocation14] }
  0x2c   : > { %s157_s30 = scalar_lea.vmem [#allocation8], %s569_s11  ;;  %s736_s5 = smov 640  }
  0x2d   : > { %s168_s29 = sld [smem:[%s575_s19]]   ;;  %s176_s4 = sshll.u32 %s157_s30, 4  ;;  %s177_s4 = int_to_ptr.vmem [resolvable:$true] %s176_s4 }
  0x2e   : > { %577 = sst [smem:[#allocation11 + $0x1]] (%p807_p5), %s736_s5  ;;  %s737_s6 = smov 5  }
  0x2f   : > { %578 = sst [smem:[#allocation11 + $0x2]] (%p807_p5), %s737_s6  ;;  %s738_s7 = smov 128  }
  0x30   : > { %579 = sst [smem:[#allocation11 + $0x3]] (%p807_p5), %s738_s7  ;;  %s739_s8 = smov 8  }
  0x31   : > { %580 = sst [smem:[#allocation11 + $0x4]] (%p807_p5), %s738_s7  ;;  %s154_s11 = scalar_lea.sflag [#allocation3], %s153_s9 }
  0x32   : > { %581 = sst [smem:[#allocation11 + $0x5]] (%p807_p5), %s739_s8  ;;  %s740_s19 = smov 131072  }
  0x33   : > { %s529_s10 = sshll.u32 %s168_s29, 26 }
  0x34   : > { %s530_s17 = sadd.s32 134217728, %s529_s10 }
  0x35   : > { %582 = dma.general (%p807_p5), %s163_s28, 1920, %s177_s4, %s154_s11, %s740_s19, [#allocation11], %s530_s17, 0  }
  0x36 PF: > { %201 = sbr.rel (%p828_p13) target bundleno = 117 (0x75), region = 32  ;;  %p1078_p4 = scmp.eq.s32.totalorder (!%p828_p13), %s789_s16, 0 }
  0x3b   : > { %702 = dma.done.wait (%p1078_p4), [#allocation5], 16   ;;  %p1079_p12 = pmov %p1078_p4 }
  0x3c   : > { %p1080_p0 = pmov %p1078_p4 }
  0x3d   : > { %704 = vsyncadd (%p1079_p12), [#allocation5], 4294967280 }
  0x3e   : > { %706 = dma.done.wait (%p1080_p0), [#allocation6], 16   ;;  %p1081_p2 = pmov %p1080_p0 }
  0x3f   : > { %s885_s22 = sand.u32 1, %s723_s13  }
  0x40   : > { %708 = vsyncadd (%p1081_p2), [#allocation6], 4294967280  ;;  %s570_s26 = smul.u32 120, %s885_s22  ;;  %s212_s9 = scalar_lea.sflag [#allocation3], %s885_s22 }
  0x42   : > { %s891_s20 = scalar_lea.vmem [#allocation8], %s570_s26 }
  0x43   : > { %710 = dma.done.wait (%p813_p6), %s212_s9, 1920  }
  0x44   : > { %712 = vsyncadd (%p813_p6), %s212_s9, 4294965376 }
  0x45   : > { %220 = sfence }
  0x46   : > { %s241_s27 = sld [smem:[#allocation2]]  ;;  %v898_v0 = vld [vmem:[%s891_s20] sm:$0xff]  ;;  %v901_v1 = vld [vmem:[%s891_s20 + $0x8] sm:$0xff]  ;;  %v904_v2 = vld [vmem:[%s891_s20 + $0x10] sm:$0xff]  ;;  %s980_s11 = scalar_lea.vmem [#allocation9], %s570_s26 }
  0x47   : > { %s534_s28 = sld [smem:[#allocation2 + $0x1]]  ;;  %v909_v3 = vld [vmem:[%s891_s20 + $0x28] sm:$0xff]  ;;  %v912_v4 = vld [vmem:[%s891_s20 + $0x30] sm:$0xff]  ;;  %v915_v5 = vld [vmem:[%s891_s20 + $0x38] sm:$0xff]  ;;  %s390_s19 = scalar_lea.sflag [#allocation4], %s885_s22 }
  0x48   : > { %s535_s29 = sld [smem:[#allocation2 + $0x2]]  ;;  %v920_v6 = vld [vmem:[%s891_s20 + $0x50] sm:$0xff]  ;;  %v923_v8 = vld [vmem:[%s891_s20 + $0x58] sm:$0xff]  ;;  %v926_v9 = vld [vmem:[%s891_s20 + $0x60] sm:$0xff] }
  0x49   : > { %s250_s30 = sld [smem:[#allocation7]]  ;;  %v932_v14 = vld [vmem:[%s891_s20 + $0x18] sm:$0xff]  ;;  %v935_v15 = vld [vmem:[%s891_s20 + $0x40] sm:$0xff]  ;;  %v943_v20 = vld [vmem:[%s891_s20 + $0x68] sm:$0xff] }
  0x4a   : > { %s906_s23 = sld [smem:[#allocation2 + $0x3]]  ;;  %v946_v21 = vld [vmem:[%s891_s20 + $0x20] sm:$0xff]  ;;  %v949_v22 = vld [vmem:[%s891_s20 + $0x48] sm:$0xff]  ;;  %v957_v27 = vld [vmem:[%s891_s20 + $0x70] sm:$0xff] }
  0x4b   : > { %s917_s4 = sld [smem:[#allocation2 + $0x4]] }
  0x4c   : > { %v270_v7 = vstv %s241_s27  ;;  %s937_s5 = sld [smem:[#allocation2 + $0x5]] }
  0x4d   : > { %v271_v10 = vmul.f32 %v270_v7, %v898_v0  ;;  %v276_v11 = vstv %s534_s28  ;;  %v272_v12 = vmul.f32 %v270_v7, %v901_v1  ;;  %v273_v13 = vmul.f32 %v270_v7, %v904_v2  ;;  %s951_s6 = sld [smem:[#allocation7 + $0x1]] }
  0x4e   : > { %v277_v16 = vmul.f32 %v909_v3, %v276_v11  ;;  %v287_v17 = vstv %s535_s29  ;;  %v278_v18 = vmul.f32 %v912_v4, %v276_v11  ;;  %v279_v19 = vmul.f32 %v915_v5, %v276_v11  ;;  %s965_s7 = sld [smem:[#allocation2 + $0x6]] }
  0x4f   : > { %v288_v23 = vmul.f32 %v920_v6, %v287_v17  ;;  %v298_v24 = vstv %s250_s30  ;;  %v289_v25 = vmul.f32 %v923_v8, %v287_v17  ;;  %v290_v26 = vmul.f32 %v926_v9, %v287_v17  ;;  %s969_s8 = sld [smem:[#allocation2 + $0x7]] }
  0x50   : > { %v282_v28 = vadd.f32 %v277_v16, %v271_v10  ;;  %v283_v29 = vadd.f32 %v278_v18, %v272_v12  ;;  %v284_v30 = vadd.f32 %v279_v19, %v273_v13  ;;  %v274_v31 = vmul.f32 %v270_v7, %v932_v14  ;;  %s972_s10 = sld [smem:[#allocation2 + $0x8]] }
  0x51   : > { %v280_v32 = vmul.f32 %v935_v15, %v276_v11  ;;  %v291_v33 = vmul.f32 %v943_v20, %v287_v17  ;;  %v275_v34 = vmul.f32 %v270_v7, %v946_v21  ;;  %v281_v35 = vmul.f32 %v949_v22, %v276_v11  ;;  %s976_s17 = sld [smem:[#allocation7 + $0x2]] }
  0x52   : > { %v293_v36 = vadd.f32 %v288_v23, %v282_v28  ;;  %v294_v37 = vadd.f32 %v289_v25, %v283_v29  ;;  %v295_v38 = vadd.f32 %v290_v26, %v284_v30  ;;  %v292_v39 = vmul.f32 %v957_v27, %v287_v17 }
  0x53   : > { %v285_v40 = vadd.f32 %v280_v32, %v274_v31  ;;  %v286_v41 = vadd.f32 %v281_v35, %v275_v34  ;;  %v309_v42 = vstv %s906_s23  ;;  %v315_v43 = vstv %s917_s4 }
  0x54   : > { %v299_v44 = vadd.f32 %v298_v24, %v293_v36  ;;  %v300_v45 = vadd.f32 %v298_v24, %v294_v37  ;;  %v301_v46 = vadd.f32 %v298_v24, %v295_v38  ;;  %v310_v47 = vmul.f32 %v309_v42, %v898_v0 }
  0x55   : > { %v296_v48 = vadd.f32 %v291_v33, %v285_v40  ;;  %v297_v49 = vadd.f32 %v292_v39, %v286_v41  ;;  %v316_v50 = vmul.f32 %v909_v3, %v315_v43  ;;  %v326_v51 = vstv %s937_s5 }
  0x56   : > { %304 = vst [vmem:[%s980_s11] sm:$0xff] %v299_v44  ;;  %305 = vst [vmem:[%s980_s11 + $0x8] sm:$0xff] %v300_v45  ;;  %v327_v52 = vmul.f32 %v920_v6, %v326_v51  ;;  %v337_v53 = vstv %s951_s6  ;;  %v311_v54 = vmul.f32 %v309_v42, %v901_v1  ;;  %v317_v55 = vmul.f32 %v912_v4, %v315_v43 }
  0x57   : > { %306 = vst [vmem:[%s980_s11 + $0x10] sm:$0xff] %v301_v46  ;;  %v302_v56 = vadd.f32 %v298_v24, %v296_v48  ;;  %v303_v57 = vadd.f32 %v298_v24, %v297_v49  ;;  %v321_v58 = vadd.f32 %v316_v50, %v310_v47  ;;  %v328_v59 = vmul.f32 %v923_v8, %v326_v51 }
  0x58   : > { %v322_v60 = vadd.f32 %v317_v55, %v311_v54  ;;  %v312_v61 = vmul.f32 %v309_v42, %v904_v2  ;;  %v318_v62 = vmul.f32 %v915_v5, %v315_v43  ;;  %v329_v63 = vmul.f32 %v926_v9, %v326_v51 }
  0x59   : > { %307 = vst [vmem:[%s980_s11 + $0x18] sm:$0xff] %v302_v56  ;;  %308 = vst [vmem:[%s980_s11 + $0x20] sm:$0xff] %v303_v57  ;;  %v332_v7 = vadd.f32 %v327_v52, %v321_v58  ;;  %v313_v10 = vmul.f32 %v309_v42, %v932_v14  ;;  %v319_v11 = vmul.f32 %v935_v15, %v315_v43  ;;  %v349_v25 = vstv %s965_s7 }
  0x5a   : > { %v330_v12 = vmul.f32 %v943_v20, %v326_v51  ;;  %v333_v13 = vadd.f32 %v328_v59, %v322_v60  ;;  %v323_v16 = vadd.f32 %v318_v62, %v312_v61  ;;  %v314_v17 = vmul.f32 %v309_v42, %v946_v21 }
  0x5b   : > { %v320_v18 = vmul.f32 %v949_v22, %v315_v43  ;;  %v338_v19 = vadd.f32 %v337_v53, %v332_v7  ;;  %v324_v23 = vadd.f32 %v319_v11, %v313_v10  ;;  %v331_v24 = vmul.f32 %v957_v27, %v326_v51 }
  0x5c   : > { %v339_v26 = vadd.f32 %v337_v53, %v333_v13  ;;  %v334_v28 = vadd.f32 %v329_v63, %v323_v16  ;;  %v350_v30 = vmul.f32 %v349_v25, %v898_v0  ;;  %v355_v32 = vstv %s969_s8 }
  0x5d   : > { %v325_v29 = vadd.f32 %v320_v18, %v314_v17  ;;  %554 = vst [vmem:[%s980_s11 + $0x28] sm:$0xff] %v338_v19  ;;  %v335_v31 = vadd.f32 %v330_v12, %v324_v23  ;;  %v366_v33 = vstv %s972_s10  ;;  %v377_v34 = vstv %s976_s17 }
  0x5e   : > { %555 = vst [vmem:[%s980_s11 + $0x30] sm:$0xff] %v339_v26  ;;  %v340_v35 = vadd.f32 %v337_v53, %v334_v28  ;;  %v356_v37 = vmul.f32 %v909_v3, %v355_v32  ;;  %v367_v38 = vmul.f32 %v920_v6, %v366_v33  ;;  %v351_v40 = vmul.f32 %v349_v25, %v901_v1 }
  0x5f   : > { %v336_v36 = vadd.f32 %v331_v24, %v325_v29  ;;  %v341_v39 = vadd.f32 %v337_v53, %v335_v31  ;;  %v357_v41 = vmul.f32 %v912_v4, %v355_v32  ;;  %v368_v0 = vmul.f32 %v923_v8, %v366_v33 }
  0x60   : > { %556 = vst [vmem:[%s980_s11 + $0x38] sm:$0xff] %v340_v35  ;;  %v361_v43 = vadd.f32 %v356_v37, %v350_v30  ;;  %v352_v44 = vmul.f32 %v349_v25, %v904_v2  ;;  %v358_v45 = vmul.f32 %v915_v5, %v355_v32  ;;  %v369_v3 = vmul.f32 %v926_v9, %v366_v33 }
  0x61   : > { %v342_v42 = vadd.f32 %v337_v53, %v336_v36  ;;  %557 = vst [vmem:[%s980_s11 + $0x40] sm:$0xff] %v341_v39  ;;  %v362_v46 = vadd.f32 %v357_v41, %v351_v40  ;;  %v353_v6 = vmul.f32 %v349_v25, %v932_v14  ;;  %v359_v1 = vmul.f32 %v935_v15, %v355_v32 }
  0x62   : > { %v372_v4 = vadd.f32 %v367_v38, %v361_v43  ;;  %v363_v8 = vadd.f32 %v358_v45, %v352_v44  ;;  %v370_v47 = vmul.f32 %v943_v20, %v366_v33  ;;  %v354_v2 = vmul.f32 %v349_v25, %v946_v21 }
  0x63   : > { %558 = vst [vmem:[%s980_s11 + $0x48] sm:$0xff] %v342_v42  ;;  %v373_v5 = vadd.f32 %v368_v0, %v362_v46  ;;  %v364_v48 = vadd.f32 %v359_v1, %v353_v6  ;;  %v360_v9 = vmul.f32 %v949_v22, %v355_v32  ;;  %v371_v14 = vmul.f32 %v957_v27, %v366_v33 }
  0x64   : > { %v378_v49 = vadd.f32 %v377_v34, %v372_v4  ;;  %v374_v15 = vadd.f32 %v369_v3, %v363_v8 }
  0x65   : > { %v379_v50 = vadd.f32 %v377_v34, %v373_v5  ;;  %v375_v51 = vadd.f32 %v370_v47, %v364_v48  ;;  %v365_v52 = vadd.f32 %v360_v9, %v354_v2 }
  0x66   : > { %559 = vst [vmem:[%s980_s11 + $0x50] sm:$0xff] %v378_v49  ;;  %v380_v53 = vadd.f32 %v377_v34, %v374_v15 }
  0x67   : > { %560 = vst [vmem:[%s980_s11 + $0x58] sm:$0xff] %v379_v50  ;;  %v381_v20 = vadd.f32 %v377_v34, %v375_v51  ;;  %v376_v54 = vadd.f32 %v371_v14, %v365_v52 }
  0x68   : > { %561 = vst [vmem:[%s980_s11 + $0x60] sm:$0xff] %v380_v53 }
  0x69   : > { %562 = vst [vmem:[%s980_s11 + $0x68] sm:$0xff] %v381_v20  ;;  %v382_v21 = vadd.f32 %v377_v34, %v376_v54 }
  0x6b   : > { %563 = vst [vmem:[%s980_s11 + $0x70] sm:$0xff] %v382_v21 }
  0x6c   : > { %s568_s26 = smul.u32 640, %s789_s16  ;;  %s413_s9 = sshll.u32 %s980_s11, 4  ;;  %s414_s9 = int_to_ptr.vmem [resolvable:$true] %s413_s9 }
  0x6d   : > { %s741_s29 = smov 640   ;;  %s742_s22 = smov 2560  }
  0x6e   : > { %s402_s28 = scalar_lea.hbm %s1070_s3, %s568_s26  ;;  %588 = sst [smem:[#allocation13]] (%p820_p11), %s741_s29 }
  0x6f   : > { %589 = sst [smem:[#allocation13 + $0x1]] (%p820_p11), %s742_s22  ;;  %s743_s30 = smov 5  }
  0x70   : > { %590 = sst [smem:[#allocation13 + $0x2]] (%p820_p11), %s743_s30  ;;  %s744_s23 = smov 128  }
  0x71   : > { %591 = sst [smem:[#allocation13 + $0x3]] (%p820_p11), %s744_s23  ;;  %s745_s16 = smov 8  }
  0x72   : > { %592 = sst [smem:[#allocation13 + $0x4]] (%p820_p11), %s744_s23  ;;  %s746_s4 = smov 131072  }
  0x73   : > { %593 = sst [smem:[#allocation13 + $0x5]] (%p820_p11), %s745_s16  ;;  %s747_s5 = smov 0  }
  0x74   : > { %594 = dma.general (%p820_p11), %s414_s9, 1920, %s402_s28, %s390_s19, %s746_s4, [#allocation13], %s747_s5, 0  }
  0x75 PF: > { %p611_p5 = scmp.ge.s32.totalorder %s731_s15, 2  ;;  %s441_s6 = sand.u32 1, %s719_s12  }
  0x76   : > { %p1082_p6 = scmp.ne.s32.totalorder %s1075_s25, 0  ;;  %s442_s7 = scalar_lea.sflag [#allocation4], %s441_s6 }
  0x78   : > { %p604_p13 = pnand %p611_p5, %p1082_p6 }
  0x7a   : > { %p605_p3 = pneg %p604_p13 }
  0x7c   : > { %714 = dma.done.wait (%p605_p3), %s442_s7, 1920  }
  0x7d   : > { %716 = vsyncadd (%p605_p3), %s442_s7, 4294965376  ;;  %p18_p7 = scmp.ge.s32.totalorder %s793_s18, 6   ;;  %s1083_s12 = smov %s723_s13 }
  0x7e   : > { %s1084_s13 = smov %s727_s14  ;;  %s1085_s14 = smov %s805_s21 }
  0x7f   : > { %s1086_s15 = smov %s793_s18  ;;  %20 = sbr.rel (!%p18_p7) target bundleno = 7 (0x7), region = 101 }
  0x84   :  { %447 = vsyncpa [#allocation3], 1 }
  0x85   :  { %449 = vsyncpa [#allocation3 + $0x1], 1 }
  0x86   :  { %450 = vsyncpa [#allocation4], 1 }
  0x87   :  { %452 = vsyncpa [#allocation4 + $0x1], 1 }
  0x88   :  { %453 = vsyncpa [#allocation5], 1 }
  0x89   :  { %455 = vsyncpa [#allocation5 + $0x1], 1 }
  0x8a   :  { %456 = vsyncpa [#allocation6], 1 }
  0x8b   :  { %458 = vsyncpa [#allocation6 + $0x1], 1 }

</bundles_post_ra>
